<compile_context>
chip_gen: v7x
topology: tpu7x:2x2x1
jax: 0.10.0
libtpu: 0.0.40
codegen_flags: <defaults>
</compile_context>

<pallas_src>
import jax
import jax.numpy as jnp
from jax.experimental import pallas as pl
from jax.experimental.pallas import tpu as pltpu

D_IN, D_HID, D_OUT = 128, 1024, 512


# ---------------------------------------------------------------------------
# Kernels
# ---------------------------------------------------------------------------
def _fused_kernel(x_ref, w_ref, b_ref, o_ref):
    """y = x @ W_fused + b_fused  (single MXU matmul, f32 accumulation)."""
    x = x_ref[...].astype(w_ref.dtype)
    y = jnp.dot(x, w_ref[...], preferred_element_type=jnp.float32)
    o_ref[...] = (y + b_ref[...]).astype(o_ref.dtype)


def _unfused_kernel(x_ref, w1_ref, b1_ref, w2_ref, b2_ref, o_ref):
    """y = (x @ W1^T + b1) @ W2^T + b2  (two MXU matmuls, f32 accumulation)."""
    x = x_ref[...].astype(w1_ref.dtype)
    h = jnp.dot(x, w1_ref[...], preferred_element_type=jnp.float32) + b1_ref[...]
    y = jnp.dot(h.astype(w2_ref.dtype), w2_ref[...],
                preferred_element_type=jnp.float32) + b2_ref[...]
    o_ref[...] = y.astype(o_ref.dtype)


# ---------------------------------------------------------------------------
# One-time parameter prep (NOT on the per-call hot path)
# ---------------------------------------------------------------------------
def prepare_params(w1, b1, w2, b2, *, weight_dtype=jnp.bfloat16, fuse=True):
    """Re-layout (and optionally fuse) the torch-layout params once.

    fuse=True  -> (w_fused (128,512) weight_dtype, b_fused (1,512) f32)
    fuse=False -> (w1^T (128,1024), b1 (1,1024) f32, w2^T (1024,512), b2 (1,512) f32)
    """
    w1 = jnp.asarray(w1, jnp.float32)   # (1024, 128)  torch (out, in) layout
    b1 = jnp.asarray(b1, jnp.float32)   # (1024,)
    w2 = jnp.asarray(w2, jnp.float32)   # (512, 1024)
    b2 = jnp.asarray(b2, jnp.float32)   # (512,)
    if fuse:
        # No activation between fc1 and fc2 in the reference module, so the two
        # affine layers collapse exactly (computed in f32, stored in bf16).
        w_fused = (w1.T @ w2.T).astype(weight_dtype)      # (128, 512)
        b_fused = (b1 @ w2.T + b2).reshape(1, D_OUT)      # (1, 512) f32
        return w_fused, b_fused
    return (w1.T.astype(weight_dtype), b1.reshape(1, D_HID),
            w2.T.astype(weight_dtype), b2.reshape(1, D_OUT))


def _choose_tile_b(B):
    if B <= 8:
        return B                          # block == full array dim (allowed)
    half = (B + 1) // 2
    tile = ((half + 7) // 8) * 8          # >= 2 grid steps for v7x's 2 TCs, 8-row aligned
    return min(256, tile)                 # cap keeps unfused f32 h <= 1 MiB per step


# ---------------------------------------------------------------------------
# Wrapper
# ---------------------------------------------------------------------------
def shared_subnetwork(x, *params, tile_b=None, out_dtype=None):
    """Forward pass.  `params` comes from prepare_params (fused: 2, unfused: 4)."""
    B, d_in = x.shape
    assert d_in == D_IN, f"expected input dim {D_IN}, got {d_in}"
    fused = len(params) == 2
    out_dtype = x.dtype if out_dtype is None else out_dtype
    tile_b = _choose_tile_b(B) if tile_b is None else tile_b
    grid = (pl.cdiv(B, tile_b),)

    nbytes = lambda a: a.size * a.dtype.itemsize
    w_bytes = sum(nbytes(p) for p in params)   # weights streamed once (VMEM-resident across tiles)
    cost = pl.CostEstimate(
        flops=2 * B * (D_IN * D_OUT if fused else (D_IN * D_HID + D_HID * D_OUT)),
        transcendentals=0,
        bytes_accessed=nbytes(x) + w_bytes + B * D_OUT * jnp.dtype(out_dtype).itemsize,
    )

    x_spec = pl.BlockSpec((tile_b, D_IN), lambda i: (i, 0))      # streamed per batch tile
    out_spec = pl.BlockSpec((tile_b, D_OUT), lambda i: (i, 0))
    const = lambda shape: pl.BlockSpec(shape, lambda i: (0, 0))  # constant block -> VMEM-resident
    if fused:
        kernel = _fused_kernel
        in_specs = [x_spec, const((D_IN, D_OUT)), const((1, D_OUT))]
    else:
        kernel = _unfused_kernel
        in_specs = [x_spec, const((D_IN, D_HID)), const((1, D_HID)),
                    const((D_HID, D_OUT)), const((1, D_OUT))]

    return pl.pallas_call(
        kernel,
        out_shape=jax.ShapeDtypeStruct((B, D_OUT), out_dtype),
        grid_spec=pltpu.PrefetchScalarGridSpec(
            num_scalar_prefetch=0,
            grid=grid,
            in_specs=in_specs,
            out_specs=out_spec,
        ),
        compiler_params=pltpu.CompilerParams(
            dimension_semantics=("parallel",),   # batch tiles shard across v7x's 2 TCs
        ),
        cost_estimate=cost,
    )(x, *params)


def init_params(key):
    """PyTorch nn.Linear default init: U(+/- 1/sqrt(fan_in))."""
    k1, k2, k3, k4 = jax.random.split(key, 4)
    bound1 = 1.0 / jnp.sqrt(128.0)
    bound2 = 1.0 / jnp.sqrt(1024.0)
    w1 = jax.random.uniform(k1, (1024, 128), jnp.float32, -bound1, bound1)
    b1 = jax.random.uniform(k2, (1024,),     jnp.float32, -bound1, bound1)
    w2 = jax.random.uniform(k3, (512, 1024), jnp.float32, -bound2, bound2)
    b2 = jax.random.uniform(k4, (512,),      jnp.float32, -bound2, bound2)
    return w1, b1, w2, b2


if __name__ == "__main__":
    key = jax.random.PRNGKey(0)
    kx, kp = jax.random.split(key)
    B = 16                                   # small demo batch -> grid=(2,), exercises tiling
    x = jax.random.normal(kx, (B, D_IN), jnp.float32)
    w1, b1, w2, b2 = init_params(kp)

    # --- fused hot path (default) ---
    w_f, b_f = prepare_params(w1, b1, w2, b2)                  # one-time prep
    out = jax.block_until_ready(shared_subnetwork(x, w_f, b_f))
    assert out.shape == (B, D_OUT) and out.dtype == x.dtype

    # --- unfused two-matmul path (structural parity / debugging) ---
    u = prepare_params(w1, b1, w2, b2, fuse=False)
    out_unf = jax.block_until_ready(shared_subnetwork(x, *u))
    assert out_unf.shape == (B, D_OUT)

    # Reference 1: same bf16-rounded fused operands, f32 accumulation (tight).
    x_b = x.astype(jnp.bfloat16).astype(jnp.float32)
    ref_bf16 = x_b @ w_f.astype(jnp.float32) + b_f
    assert jnp.allclose(out, ref_bf16, atol=1e-3, rtol=1e-3), "fused vs bf16 reference"

    # Reference 2: original fp32 module semantics (loose: bf16 weight rounding).
    ref_f32 = (x @ w1.T + b1) @ w2.T + b2
    assert jnp.allclose(out, ref_f32, atol=5e-2, rtol=5e-2), "fused vs fp32 reference"
    assert jnp.allclose(out_unf, ref_f32, atol=5e-2, rtol=5e-2), "unfused vs fp32 reference"
    assert jnp.allclose(out, out_unf, atol=5e-2, rtol=5e-2), "fused vs unfused"

    print("KERNEL_OK")
</pallas_src>

<mosaic_0001>
module attributes {stable_mosaic.version = 11 : i64} {
  func.func @_fused_kernel(%arg0: i32, %arg1: memref<8x128xf32, #tpu.memory_space<vmem>>, %arg2: memref<128x512xbf16, #tpu.memory_space<vmem>>, %arg3: memref<1x512xf32, #tpu.memory_space<vmem>>, %arg4: memref<8x512xf32, #tpu.memory_space<vmem>>) attributes {dimension_semantics = [#tpu.dimension_semantics<parallel>], iteration_bounds = array<i64: 2>, scalar_prefetch = 0 : i64, scratch_operands = 0 : i64, tpu.core_type = #tpu.core_type<tc>, window_params = [{transform_indices = @transform_0, window_bounds = array<i64: 8, 128>}, {pipeline_mode = #tpu.pipeline_mode<synchronous>, transform_indices = @transform_1, window_bounds = array<i64: 128, 512>}, {pipeline_mode = #tpu.pipeline_mode<synchronous>, transform_indices = @transform_2, window_bounds = array<i64: 1, 512>}, {transform_indices = @transform_3, window_bounds = array<i64: 8, 512>}]} {
    %c0 = arith.constant 0 : index
    %c0_0 = arith.constant 0 : index
    %0 = vector.load %arg1[%c0, %c0_0] : memref<8x128xf32, #tpu.memory_space<vmem>>, vector<8x128xf32>
    %1 = arith.truncf %0 : vector<8x128xf32> to vector<8x128xbf16>
    %c0_1 = arith.constant 0 : index
    %c0_2 = arith.constant 0 : index
    %2 = vector.load %arg2[%c0_1, %c0_2] : memref<128x512xbf16, #tpu.memory_space<vmem>>, vector<128x512xbf16>
    %cst = arith.constant dense<0.000000e+00> : vector<8x512xf32>
    %3 = tpu.matmul %1, %2, %cst {dimension_numbers = #tpu.dot_dimension_numbers<[1], [0], [0], [1], [0, 0, 1, 1], [], []>} : vector<8x128xbf16>, vector<128x512xbf16>, vector<8x512xf32> -> vector<8x512xf32>
    %c0_3 = arith.constant 0 : index
    %c0_4 = arith.constant 0 : index
    %4 = vector.load %arg3[%c0_3, %c0_4] : memref<1x512xf32, #tpu.memory_space<vmem>>, vector<1x512xf32>
    %5 = vector.broadcast %4 : vector<1x512xf32> to vector<8x512xf32>
    %6 = arith.addf %3, %5 : vector<8x512xf32>
    %c0_5 = arith.constant 0 : index
    %c0_6 = arith.constant 0 : index
    %7 = vector.load %arg4[%c0_5, %c0_6] : memref<8x512xf32, #tpu.memory_space<vmem>>, vector<8x512xf32>
    tpu.vector_store %arg4[%c0_5, %c0_6], %6 {strides = array<i32>} : memref<8x512xf32, #tpu.memory_space<vmem>>, vector<8x512xf32>,
    return
  }
  func.func @transform_0(%arg0: i32) -> (i32, i32) {
    %c0_i32 = arith.constant 0 : i32
    %c0_i32_0 = arith.constant 0 : i32
    return %arg0, %c0_i32 : i32, i32
  }
  func.func @transform_1(%arg0: i32) -> (i32, i32) {
    %c0_i32 = arith.constant 0 : i32
    %c0_i32_0 = arith.constant 0 : i32
    %c0_i32_1 = arith.constant 0 : i32
    return %c0_i32, %c0_i32_0 : i32, i32
  }
  func.func @transform_2(%arg0: i32) -> (i32, i32) {
    %c0_i32 = arith.constant 0 : i32
    %c0_i32_0 = arith.constant 0 : i32
    %c0_i32_1 = arith.constant 0 : i32
    return %c0_i32, %c0_i32_0 : i32, i32
  }
  func.func @transform_3(%arg0: i32) -> (i32, i32) {
    %c0_i32 = arith.constant 0 : i32
    %c0_i32_0 = arith.constant 0 : i32
    return %arg0, %c0_i32 : i32, i32
  }
}

</mosaic_0001>

<bundles_post_ra>
// kernel: tpu_custom_call.1
= control target key start
LH: loop header
LB: loop body
LE: loop exit
PB: predicated region body
PF: predicated region fallthrough
CT: control target
= control target key end

     0   :  { %8 = vsyncpa [#allocation3], 0  ;;  %s1114_s0 = inlined_call_operand.hbm [shape: f32[16,128], index: 0, kind: input, shape index: {}]   ;;  %s1115_s1 = inlined_call_operand.hbm [shape: bf16[128,512], index: 1, kind: input, shape index: {}]   ;;  %s1116_s2 = inlined_call_operand.vmem [shape: f32[1,512], index: 2, kind: input, shape index: {}]   ;;  %s1117_s3 = inlined_call_operand.hbm [shape: f32[16,512], index: 3, kind: output, shape index: {}]  }
   0x1   :  { %10 = vsyncpa [#allocation3 + $0x1], 0 }
   0x2   :  { %11 = vsyncpa [#allocation6], 0 }
   0x3   :  { %12 = vsyncpa [#allocation4], 0 }
   0x4   :  { %14 = vsyncpa [#allocation4 + $0x1], 0  ;;  %s911_s12 = smov 0   ;;  %s913_s13 = smov 0  }
   0x5   :  { %s915_s14 = smov 0   ;;  %s917_s15 = smov 0  }
   0x6 LB: > { %s932_s16 = sadd.s32 4294967295, %s883_s15   ;;  %s599_s17 = sadd.s32 4294967294, %s883_s15   ;;  %s883_s15 = sphi %s917_s15, %s1137_s15   ;;  %s879_s14 = sphi %s915_s14, %s1136_s14   ;;  %s875_s13 = sphi %s913_s13, %s1135_s13   ;;  %s871_s12 = sphi %s911_s12, %s1134_s12  }
   0x7   : > { %p40_p0 = scmp.ne.s32.totalorder %s875_s13, %s871_s12  ;;  %p1118_p1 = scmp.eq.s32.totalorder %s932_s16, 0 }
   0x8   : > { %p112_p3 = scmp.eq.s32.totalorder %s599_s17, 1  ;;  %p600_p5 = scmp.ge.s32.totalorder %s883_s15, 1 }
   0x9   : > { %p941_p4 = por %p1118_p1, %p40_p0  ;;  %p119_p7 = scmp.lt.s32.totalorder %s883_s15, 3 }
   0xa   : > { %p946_p6 = por %p112_p3, %p40_p0  ;;  %s885_s21 = smov [#allocation5]  }
   0xb   : > { %s1121_s18 = scalar_select %p941_p4, 1, 0 }
   0xc   : > { %s1122_s19 = scalar_select %p946_p6, 1, 0 }
   0xd   : > { %p951_p8 = pnand %p600_p5, %p119_p7  ;;  %s131_s22 = sshll.u32 %s885_s21, 4  ;;  %s955_s22 = int_to_ptr.vmem [resolvable:$true] %s131_s22 }
   0xe   : > { %s967_s24 = sadd.s32 1, %s883_s15   ;;  %s27_s25 = sadd.s32 1, %s879_s14 }
   0xf   : > { %s1123_s20 = scalar_select %p951_p8, 1, 0 }
  0x10   : > { %p655_p9 = pneg %p951_p8  ;;  %s24_s26 = ssub.s32 %s883_s15, %s967_s24 }
  0x11   : > { %s755_s29 = scalar_lea.hbm %s1115_s1, 4096 }
  0x12   : > { %p962_p11 = pnand %p655_p9, %p1118_p1  ;;  %p756_p12 = scmp.ne.s32.totalorder %s1115_s1, %s755_s29 }
  0x13   : > { %p762_p5 = scmp.lt.u32.totalorder %s755_s29, %s1115_s1 }
  0x14   : > { %p757_p13 = pneg %p962_p11 }
  0x16   : > { %p758_p0 = pnand %p757_p13, %p756_p12 }
  0x18   : > { %p759_p3 = pneg %p758_p0 }
  0x1a   : > { %p764_p7 = pnand %p762_p5, %p759_p3 }
  0x1c   : > { %767 = shalt.err (!%p764_p7)
}
  0x1d   : > { %s768_s7 = scalar_lea.vmem %s955_s22, 4096  ;;  %p776_p2 = scmp.lt.s32.totalorder %s955_s22, %s955_s22 }
  0x1e   : > { %p769_p9 = scmp.ne.s32.totalorder %s955_s22, %s768_s7  ;;  %p777_p6 = scmp.lt.s32.totalorder %s768_s7, %s768_s7 }
  0x20   : > { %p771_p10 = pnand %p769_p9, %p757_p13  ;;  %p778_p4 = por %p777_p6, %p776_p2 }
  0x22   : > { %p772_p1 = pneg %p771_p10 }
  0x24   : > { %p779_p8 = pnand %p778_p4, %p772_p1 }
  0x26   : > { %782 = shalt.err (!%p779_p8)
}
  0x27   : > { %s886_s8 = smov 256   ;;  %s887_s9 = smov 16  }
  0x28   : > { %658 = dma.hbm_to_vmem [thread:$0]  (!%p962_p11), %s1115_s1, 4096, %s955_s22, [#allocation6], %s886_s8, %s886_s8, %s887_s9  }
  0x29   : > { %p25_p2 = scmp.eq.s32.totalorder %s24_s26, 0  ;;  %p34_p1 = scmp.ne.s32.totalorder %s879_s14, %s875_s13 }
  0x2a   : > { %p35_p4 = scmp.eq.s32.totalorder %s883_s15, 0  ;;  %p668_p6 = scmp.lt.s32.totalorder %s883_s15, 2 }
  0x2b   : > { %s998_s17 = scalar_select %p25_p2, %s879_s14, %s27_s25  }
  0x2c   : > { %p36_p8 = por %p35_p4, %p34_p1  ;;  %p1125_p10 = scmp.eq.s32.totalorder %s932_s16, 1 }
  0x2d   : > { %s148_s27 = sand.u32 1, %s879_s14   ;;  %s604_s28 = sshll.u32 %s883_s15, 7 }
  0x2e   : > { %p1002_p12 = por %p1125_p10, %p34_p1  ;;  %s603_s29 = sshll.u32 %s148_s27, 3 }
  0x2f   : > { %s1011_s4 = scalar_lea.hbm %s1114_s0, %s604_s28  ;;  %s152_s22 = scalar_lea.vmem [#allocation2], %s603_s29 }
  0x30   : > { %s159_s25 = sshll.u32 %s152_s22, 4  ;;  %p1013_p11 = pnand %p668_p6, %p36_p8  ;;  %s1017_s25 = int_to_ptr.vmem [resolvable:$true] %s159_s25 }
  0x31   : > { %s149_s5 = scalar_lea.sflag [#allocation3], %s148_s27  ;;  %s783_s6 = scalar_lea.hbm %s1011_s4, 128 }
  0x32   : > { %p784_p13 = scmp.ne.s32.totalorder %s1011_s4, %s783_s6  ;;  %p785_p0 = pneg %p1013_p11 }
  0x33   : > { %s788_s9 = scalar_lea.hbm %s1114_s0, 256  ;;  %p789_p7 = scmp.lt.u32.totalorder %s1011_s4, %s1114_s0 }
  0x34   : > { %p786_p3 = pnand %p785_p0, %p784_p13  ;;  %p790_p9 = scmp.lt.u32.totalorder %s788_s9, %s783_s6 }
  0x35   : > { %p792_p1 = scmp.lt.u32.totalorder %s783_s6, %s1011_s4 }
  0x36   : > { %p787_p5 = pneg %p786_p3  ;;  %p791_p2 = por %p790_p9, %p789_p7 }
  0x38   : > { %p793_p4 = por %p792_p1, %p791_p2 }
  0x3a   : > { %p794_p6 = pnand %p793_p4, %p787_p5 }
  0x3c   : > { %797 = shalt.err (!%p794_p6)
}
  0x3d   : > { %s798_s27 = scalar_lea.vmem %s1017_s25, 128  ;;  %s888_s28 = smov [#allocation2]  }
  0x3e   : > { %p799_p8 = scmp.ne.s32.totalorder %s1017_s25, %s798_s27  ;;  %s803_s29 = sshll.u32 %s888_s28, 4  ;;  %s804_s29 = int_to_ptr.vmem [resolvable:$false] %s803_s29 }
  0x3f   : > { %s805_s23 = scalar_lea.vmem %s804_s29, 256  ;;  %p806_p3 = scmp.lt.s32.totalorder %s1017_s25, %s804_s29 }
  0x40   : > { %p801_p10 = pnand %p799_p8, %p785_p0  ;;  %p807_p7 = scmp.lt.s32.totalorder %s805_s23, %s798_s27 }
  0x42   : > { %p802_p13 = pneg %p801_p10  ;;  %p808_p9 = por %p807_p7, %p806_p3 }
  0x44   : > { %p809_p2 = pnand %p808_p9, %p802_p13 }
  0x46   : > { %812 = shalt.err (!%p809_p2)
}
  0x47   : > { %662 = dma.hbm_to_vmem [thread:$0]  (!%p1013_p11), %s1011_s4, 128, %s1017_s25, %s149_s5  }
  0x48   : > { %p1128_p5 = scmp.ne.s32.totalorder %s1123_s20, 0 }
  0x49   : > { %s1047_s30 = sand.u32 (!%p1128_p5), 1, %s875_s13   ;;  %p1129_p0 = scmp.ne.s32.totalorder (!%p1128_p5), %s1121_s18, 0 }
  0x4a   : > { %168 = sbr.rel (%p1128_p5) target bundleno = 348 (0x15c), region = 32  ;;  %s606_s22 = sshll.u32 (!%p1128_p5), %s1047_s30, 3 }
  0x4b   : > { %s171_s6 = scalar_lea.sflag (!%p1128_p5), [#allocation3], %s1047_s30  ;;  %s1051_s7 = scalar_lea.vmem (!%p1128_p5), [#allocation2], %s606_s22 }
  0x51   : > { %858 = dma.done.wait (%p1129_p0), %s171_s6, 128  }
  0x52   : > { %860 = vsyncadd (%p1129_p0), %s171_s6, 4294967168  ;;  %p1130_p11 = scmp.eq.s32.totalorder %s932_s16, 0 }
  0x54   : > { %862 = dma.done.wait (%p1130_p11), [#allocation6], 4096   ;;  %p1131_p1 = pmov %p1130_p11 }
  0x55   : > { %v889_v0 = vmov 0   ;;  %v707_v1 = vld [vmem:[#allocation5 + $0x4] ss:$16 sps:$4 sm:$0xff]   ;;  %v709_v2 = vld [vmem:[#allocation5 + $0xc] ss:$16 sps:$4 sm:$0xff]   ;;  %v238_v35 = vlaneseq  ;;  %s608_s18 = sshll.u32 %s1047_s30, 5 }
  0x56   : > { %864 = vsyncadd (%p1131_p1), [#allocation6], 4294963200  ;;  %450 = vmatprep.mubr.bf16.mxu0 %v889_v0  ;;  %491 = vmatprep.mubr.bf16.mxu1 %v889_v0  ;;  %v711_v3 = vld [vmem:[#allocation5] ss:$16 sps:$4 sm:$0xff]   ;;  %v712_v4 = vld [vmem:[#allocation5 + $0x8] ss:$16 sps:$4 sm:$0xff]  }
  0x57   : > { %418 = vmatprep.subr.bf16.mxu0 %v707_v1  ;;  %459 = vmatprep.subr.bf16.mxu1 %v709_v2  ;;  %v713_v5 = vld [vmem:[#allocation5 + $0x24] ss:$16 sps:$4 sm:$0xff]   ;;  %v715_v6 = vld [vmem:[#allocation5 + $0x2c] ss:$16 sps:$4 sm:$0xff]   ;;  %v717_v7 = vld [vmem:[#allocation5 + $0x20] ss:$16 sps:$4 sm:$0xff]  }
  0x58   : > { %419 = vmatpush1.bf16.msra.mxu0 %v711_v3  ;;  %460 = vmatpush1.bf16.msra.mxu1 %v712_v4  ;;  %v718_v8 = vld [vmem:[#allocation5 + $0x28] ss:$16 sps:$4 sm:$0xff]   ;;  %v719_v9 = vld [vmem:[#allocation5 + $0x44] ss:$16 sps:$4 sm:$0xff]   ;;  %v721_v10 = vld [vmem:[#allocation5 + $0x4c] ss:$16 sps:$4 sm:$0xff]  }
  0x59   : > { %420 = vmatprep.subr.bf16.mxu0 %v713_v5  ;;  %461 = vmatprep.subr.bf16.mxu1 %v715_v6  ;;  %v723_v11 = vld [vmem:[#allocation5 + $0x40] ss:$16 sps:$4 sm:$0xff]   ;;  %v724_v12 = vld [vmem:[#allocation5 + $0x48] ss:$16 sps:$4 sm:$0xff]   ;;  %v725_v13 = vld [vmem:[#allocation5 + $0x64] ss:$16 sps:$4 sm:$0xff]  }
  0x5a   : > { %v727_v14 = vld [vmem:[#allocation5 + $0x6c] ss:$16 sps:$4 sm:$0xff]   ;;  %v729_v15 = vld [vmem:[#allocation5 + $0x60] ss:$16 sps:$4 sm:$0xff]   ;;  %v730_v16 = vld [vmem:[#allocation5 + $0x68] ss:$16 sps:$4 sm:$0xff]  }
  0x5b   : > { %v731_v17 = vld [vmem:[#allocation5 + $0x84] ss:$16 sps:$4 sm:$0xff]   ;;  %v733_v18 = vld [vmem:[#allocation5 + $0x8c] ss:$16 sps:$4 sm:$0xff]   ;;  %v735_v19 = vld [vmem:[#allocation5 + $0x80] ss:$16 sps:$4 sm:$0xff]  }
  0x5c   : > { %421 = vmatpush1.bf16.msra.mxu0 %v717_v7  ;;  %462 = vmatpush1.bf16.msra.mxu1 %v718_v8  ;;  %v736_v20 = vld [vmem:[#allocation5 + $0x88] ss:$16 sps:$4 sm:$0xff]   ;;  %v737_v21 = vld [vmem:[#allocation5 + $0xa4] ss:$16 sps:$4 sm:$0xff]   ;;  %v739_v22 = vld [vmem:[#allocation5 + $0xac] ss:$16 sps:$4 sm:$0xff]  }
  0x5d   : > { %422 = vmatprep.subr.bf16.mxu0 %v719_v9  ;;  %463 = vmatprep.subr.bf16.mxu1 %v721_v10  ;;  %v741_v23 = vld [vmem:[#allocation5 + $0xa0] ss:$16 sps:$4 sm:$0xff]   ;;  %v742_v24 = vld [vmem:[#allocation5 + $0xa8] ss:$16 sps:$4 sm:$0xff]   ;;  %v743_v25 = vld [vmem:[#allocation5 + $0xc4] ss:$16 sps:$4 sm:$0xff]  }
  0x5e   : > { %v745_v26 = vld [vmem:[#allocation5 + $0xcc] ss:$16 sps:$4 sm:$0xff]   ;;  %v747_v27 = vld [vmem:[#allocation5 + $0xc0] ss:$16 sps:$4 sm:$0xff]   ;;  %v748_v28 = vld [vmem:[#allocation5 + $0xc8] ss:$16 sps:$4 sm:$0xff]  }
  0x5f   : > { %v749_v29 = vld [vmem:[#allocation5 + $0xe4] ss:$16 sps:$4 sm:$0xff]   ;;  %v751_v30 = vld [vmem:[#allocation5 + $0xec] ss:$16 sps:$4 sm:$0xff]   ;;  %v753_v31 = vld [vmem:[#allocation5 + $0xe0] ss:$16 sps:$4 sm:$0xff]  }
  0x60   : > { %423 = vmatpush1.bf16.msra.mxu0 %v723_v11  ;;  %464 = vmatpush1.bf16.msra.mxu1 %v724_v12  ;;  %v754_v32 = vld [vmem:[#allocation5 + $0xe8] ss:$16 sps:$4 sm:$0xff]   ;;  %v239_v36 = vshrl.u32 %v238_v35, 7  ;;  %v236_v39 = vld [vmem:[%s1116_s2] sm:$0xf]  ;;  %s646_s25 = sshll.u32 %s932_s16, 9 }
  0x61   : > { %424 = vmatprep.subr.bf16.mxu0 %v725_v13  ;;  %465 = vmatprep.subr.bf16.mxu1 %v727_v14  ;;  %v202_v33 = vld [vmem:[%s1051_s7] sm:$0xff]  ;;  %s200_s26 = scalar_lea.vmem [#allocation7], %s608_s18  ;;  %s1070_s10 = scalar_lea.hbm %s1117_s3, %s646_s25 }
  0x62   : > { %v203_v34 = vpack.c.bf16 %v202_v33, %v202_v33  ;;  %v240_v37 = vsub.s32 0, %v239_v36  ;;  %v248_v38 = vsub.s32 2, %v239_v36  ;;  %v244_v40 = vsub.s32 1, %v239_v36  ;;  %s519_s5 = sshll.u32 %s200_s26, 4  ;;  %s505_s16 = scalar_lea.sflag [#allocation4], %s1047_s30  ;;  %s1072_s5 = int_to_ptr.vmem [resolvable:$true] %s519_s5 }
  0x63   : > { %v252_v41 = vsub.s32 3, %v239_v36  ;;  %s813_s11 = scalar_lea.vmem %s1072_s5, 512  ;;  %s890_s27 = smov [#allocation7]  }
  0x64   : > { %425 = vmatpush1.bf16.msra.mxu0 %v729_v15  ;;  %466 = vmatpush1.bf16.msra.mxu1 %v730_v16  ;;  %v241_v42 = vrot.slane %v236_v39, %v240_v37  ;;  %v249_v43 = vrot.slane %v236_v39, %v248_v38  ;;  %v245_v44 = vrot.slane %v236_v39, %v244_v40  ;;  %p814_p4 = scmp.ne.s32.totalorder %s1072_s5, %s813_s11  ;;  %s817_s28 = sshll.u32 %s890_s27, 4  ;;  %s818_s28 = int_to_ptr.vmem [resolvable:$false] %s817_s28 }
  0x65   : > { %426 = vmatprep.subr.bf16.mxu0 %v731_v17  ;;  %467 = vmatprep.subr.bf16.mxu1 %v733_v18  ;;  %v253_v45 = vrot.slane %v236_v39, %v252_v41  ;;  %s819_s29 = scalar_lea.vmem %s818_s28, 1024  ;;  %p820_p10 = scmp.lt.s32.totalorder %s1072_s5, %s818_s28 }
  0x66   : > { %p815_p6 = pnand %p814_p4, %p1002_p12  ;;  %p821_p13 = scmp.lt.s32.totalorder %s819_s29, %s813_s11 }
  0x68   : > { %427 = vmatpush1.bf16.msra.mxu0 %v735_v19  ;;  %468 = vmatpush1.bf16.msra.mxu1 %v736_v20  ;;  %p816_p8 = pneg %p815_p6  ;;  %p822_p3 = por %p821_p13, %p820_p10 }
  0x69   : > { %428 = vmatprep.subr.bf16.mxu0 %v737_v21  ;;  %469 = vmatprep.subr.bf16.mxu1 %v739_v22 }
  0x6a   : > { %p823_p7 = pnand %p822_p3, %p816_p8 }
  0x6c   : > { %429 = vmatpush1.bf16.msra.mxu0 %v741_v23  ;;  %470 = vmatpush1.bf16.msra.mxu1 %v742_v24 }
  0x6d   : > { %430 = vmatprep.subr.bf16.mxu0 %v743_v25  ;;  %471 = vmatprep.subr.bf16.mxu1 %v745_v26 }
  0x70   : > { %431 = vmatpush1.bf16.msra.mxu0 %v747_v27  ;;  %472 = vmatpush1.bf16.msra.mxu1 %v748_v28 }
  0x71   : > { %432 = vmatprep.subr.bf16.mxu0 %v749_v29  ;;  %473 = vmatprep.subr.bf16.mxu1 %v751_v30 }
  0x74   : > { %433 = vmatpush1.bf16.msra.mxu0 %v753_v31  ;;  %474 = vmatpush1.bf16.msra.mxu1 %v754_v32 }
  0x77   : > { %451 = vmatmul.mubr.bf16.vlgmr.msra.gmra.mrb[0].mxu0 %v203_v34  ;;  %492 = vmatmul.mubr.bf16.vlgmr.msra.gmra.mrb[0].mxu1 %v203_v34 }
 0x14a   : > { %v452_v46 = vpop.f32.mrb[0].mxu0  ;;  %v493_v47 = vpop.f32.mrb[0].mxu1 }
 0x14b   : > { %v453_v48 = vadd.f32 %v452_v46, %v241_v42  ;;  %v494_v49 = vadd.f32 %v493_v47, %v249_v43  ;;  %v454_v50 = vpop.f32.mrb[1].mxu0  ;;  %v495_v51 = vpop.f32.mrb[1].mxu1 }
 0x14c   : > { %v455_v52 = vadd.f32 %v454_v50, %v245_v44  ;;  %v496_v53 = vadd.f32 %v495_v51, %v253_v45  ;;  %v456_v54 = vpop.f32.mrb[2].mxu0  ;;  %v497_v55 = vpop.f32.mrb[2].mxu1 }
 0x14d   : > { %500 = vst [vmem:[%s200_s26] sm:$0xff] %v453_v48  ;;  %502 = vst [vmem:[%s200_s26 + $0x10] sm:$0xff] %v494_v49  ;;  %v457_v56 = vpop.f32.mrb[3].mxu0  ;;  %v498_v57 = vpop.f32.mrb[3].mxu1 }
 0x14e   : > { %501 = vst [vmem:[%s200_s26 + $0x8] sm:$0xff] %v455_v52  ;;  %503 = vst [vmem:[%s200_s26 + $0x18] sm:$0xff] %v496_v53 }
 0x14f   : > { %826 = shalt.err (!%p823_p7)
}
 0x150   : > { %s827_s23 = scalar_lea.hbm %s1070_s10, 512  ;;  %s831_s6 = scalar_lea.hbm %s1117_s3, 1024 }
 0x151   : > { %p828_p9 = scmp.ne.s32.totalorder %s1070_s10, %s827_s23  ;;  %p832_p0 = scmp.lt.u32.totalorder %s1070_s10, %s1117_s3 }
 0x152   : > { %p833_p11 = scmp.lt.u32.totalorder %s831_s6, %s827_s23  ;;  %p835_p4 = scmp.lt.u32.totalorder %s827_s23, %s1070_s10 }
 0x153   : > { %p829_p2 = pnand %p828_p9, %p1002_p12 }
 0x154   : > { %p834_p1 = por %p833_p11, %p832_p0 }
 0x155   : > { %p830_p5 = pneg %p829_p2 }
 0x156   : > { %p836_p6 = por %p835_p4, %p834_p1 }
 0x158   : > { %p837_p8 = pnand %p836_p6, %p830_p5 }
 0x15a   : > { %840 = shalt.err (!%p837_p8)
}
 0x15b   : > { %653 = dma.vmem_to_hbm [thread:$0]  (%p1002_p12), %s1072_s5, 512, %s1070_s10, %s505_s16  }
 0x15c PF: > { %s531_s20 = sand.u32 1, %s871_s12   ;;  %p1132_p10 = scmp.ne.s32.totalorder %s1122_s19, 0 }
 0x15d   : > { %p1133_p13 = scmp.ge.s32.totalorder %s883_s15, 2  ;;  %s532_s4 = scalar_lea.sflag [#allocation4], %s531_s20 }
 0x15f   : > { %p664_p3 = pnand %p1133_p13, %p1132_p10 }
 0x161   : > { %866 = dma.done.wait (!%p664_p3), %s532_s4, 512  }
 0x162   : > { %868 = vsyncadd (!%p664_p3), %s532_s4, 4294966784  ;;  %p17_p7 = scmp.ge.s32.totalorder %s967_s24, 4   ;;  %s1134_s12 = smov %s875_s13 }
 0x163   : > { %s1135_s13 = smov %s879_s14  ;;  %s1136_s14 = smov %s998_s17 }
 0x164   : > { %s1137_s15 = smov %s967_s24  ;;  %19 = sbr.rel (!%p17_p7) target bundleno = 6 (0x6), region = 81 }
 0x16b   :  { %537 = vsyncpa [#allocation3], 1 }
 0x16c   :  { %539 = vsyncpa [#allocation3 + $0x1], 1 }
 0x16d   :  { %540 = vsyncpa [#allocation6], 1 }
 0x16e   :  { %541 = vsyncpa [#allocation4], 1 }
 0x16f   :  { %543 = vsyncpa [#allocation4 + $0x1], 1 }

</bundles_post_ra>
